<compile_context>
chip_gen: v7x
topology: tpu7x:2x2x1
jax: 0.10.0
libtpu: 0.0.40
codegen_flags: <defaults>
</compile_context>

<pallas_src>
import functools

import jax
import jax.numpy as jnp
from jax.experimental import pallas as pl
from jax.experimental.pallas import tpu as pltpu

_MIB = 1024 * 1024
_ROW_ALIGN = 32          # row-tile alignment: fine for f32(8)/bf16(16)/int8(32) packing


def _tpu_vmem_capacity_bytes():
    """Per-core VMEM capacity; conservative (v7x-sized) fallback if the query fails."""
    try:
        return int(pltpu.get_tpu_info().vmem_capacity_bytes)
    except Exception:
        return 64 * _MIB


def _has_bf16_eup():
    """bf16 transcendentals exist on v6e/v7x; v5e and older are f32-only EUP."""
    try:
        kind = jax.devices()[0].device_kind.lower()
    except Exception:
        return False
    return not any(v in kind for v in ("v2", "v3", "v4", "v5"))


def _pick_block_n(n, c, logits_itemsize, vmem_cap, block_n=None):
    """Rows per grid step.

    Budget counts: 2x double-buffered logits tile, 2x lane-padded (TN,1) i32
    target tile (pads to 128 lanes -> 512 B/row each), C-wide f32 temporaries
    and a handful of (TN,1) lane-padded temporaries.  Budget is per-generation:
    min(vmem_cap/2, 48 MiB).
    """
    if block_n is not None:
        if block_n >= n:
            return n
        return max(8, (block_n // 8) * 8)

    budget = min(vmem_cap // 2, 48 * _MIB)
    per_row = (
        2 * c * logits_itemsize   # logits tile, double buffered
        + 2 * 128 * 4             # (TN, 1) i32 targets pad to a full 128-lane row
        + 8 * c * 4               # C-wide f32 temporaries (cast / sub / exp / select / iota)
        + 6 * 128 * 4             # (TN, 1) lane-padded temporaries (max / lse / masks / ...)
    )
    block_n = max(_ROW_ALIGN, budget // per_row)

    if block_n >= n:
        if n <= 2 * _ROW_ALIGN:
            return n              # single full-extent block (always legal)
        block_n = pl.cdiv(n, 2)   # split so v7x's second TensorCore gets work

    # Balance tiles across the grid and keep row counts sublane-pack friendly.
    g = pl.cdiv(n, block_n)
    tn = ((pl.cdiv(n, g) + _ROW_ALIGN - 1) // _ROW_ALIGN) * _ROW_ALIGN
    return n if tn >= n else tn


def _ce_partial_kernel(n_total, exp_dtype, logits_ref, tgt_ref, out_ref):
    # logits_ref: (TN, C) native dtype (e.g. bf16) in VMEM
    # tgt_ref:    (TN, 1) i32 in VMEM (class indices)
    # out_ref:    (1, 1, 2) f32 in SMEM -> [partial CE sum, partial valid count]
    i = pl.program_id(0)

    # Cast to f32 right after the load: bf16 HBM reads, f32 math.
    x = logits_ref[...].astype(jnp.float32)                     # (TN, C)
    tgt = tgt_ref[...]                                          # (TN, 1) i32
    tn, c = x.shape

    # Row validity: inside the real batch (ragged tail tile) AND a usable target
    # (torch's default ignore_index=-100; OOB indices are masked instead of
    # raising like torch would).
    row = jax.lax.broadcasted_iota(jnp.int32, (tn, 1), 0) + i * tn
    valid = (row < n_total) & (tgt >= 0) & (tgt < c)            # (TN, 1) bool

    # Numerically stable log-sum-exp per row.  exp is issued in bf16 on chips
    # with a bf16 EUP (v6e/v7x) -> ~2x exp throughput; sum accumulates in f32.
    m = jnp.max(x, axis=-1, keepdims=True)                      # (TN, 1)
    p = jnp.exp((x - m).astype(exp_dtype)).astype(jnp.float32)  # (TN, C)
    lse = m + jnp.log(jnp.sum(p, axis=-1, keepdims=True))       # (TN, 1)

    # Gather the target logit via a masked select (no one-hot materialize+mul).
    col = jax.lax.broadcasted_iota(jnp.int32, (tn, c), 1)       # (TN, C)
    tgt_logit = jnp.sum(jnp.where(col == tgt, x, 0.0), axis=-1, keepdims=True)

    # Mask BEFORE any accumulation so garbage/NaN in padded tail rows never leaks.
    per_row = jnp.where(valid, lse - tgt_logit, 0.0)            # (TN, 1)

    # Two scalars per step, stored straight to SMEM: no masked vector stores,
    # no per-step VMEM->HBM vector writeback.
    out_ref[0, 0, 0] = jnp.sum(per_row)
    out_ref[0, 0, 1] = jnp.sum(jnp.where(valid, 1.0, 0.0))


def costum_loss(out_logits, ce_target, regularization, gamma, *, block_n=None):
    """Pallas equivalent of CostumLoss.forward(out, ce_target, regularization).

    Returns a shape-(1,) float32 array (matching gamma's [1] broadcast in torch).
    """
    n, c = out_logits.shape
    itemsize = jnp.dtype(out_logits.dtype).itemsize

    vmem_cap = _tpu_vmem_capacity_bytes()
    tn = _pick_block_n(n, c, itemsize, vmem_cap, block_n)
    grid = pl.cdiv(n, tn)

    exp_dtype = jnp.bfloat16 if _has_bf16_eup() else jnp.float32

    tgt2d = ce_target.astype(jnp.int32).reshape(n, 1)

    partials = pl.pallas_call(
        functools.partial(_ce_partial_kernel, n, exp_dtype),
        out_shape=jax.ShapeDtypeStruct((grid, 1, 2), jnp.float32),
        grid_spec=pltpu.PrefetchScalarGridSpec(
            num_scalar_prefetch=0,
            grid=(grid,),
            in_specs=[
                pl.BlockSpec((tn, c), lambda i: (i, 0)),   # logits, native dtype
                pl.BlockSpec((tn, 1), lambda i: (i, 0)),   # class-index targets
            ],
            # Independent per-tile partials -> batch axis stays "parallel"
            # (sharded across both TensorCores on v7x); per-step result is
            # two scalars in SMEM.
            out_specs=pl.BlockSpec((1, 1, 2), lambda i: (i, 0, 0),
                                   memory_space=pltpu.MemorySpace.SMEM),
        ),
        compiler_params=pltpu.CompilerParams(
            dimension_semantics=("parallel",),
            # Generation-aware scoped VMEM: ~96 MiB on v5e/v6e (128 MiB), ~48 MiB on v7x (64 MiB).
            vmem_limit_bytes=int(min((vmem_cap * 3) // 4, 100 * _MIB)),
        ),
        cost_estimate=pl.CostEstimate(
            flops=8 * n * c,
            transcendentals=n * c,
            bytes_accessed=n * c * itemsize + n * 4 + grid * 8,
        ),
    )(out_logits, tgt2d)

    # Tiny scalar epilogue in plain JAX: mean over valid targets + gamma * reg.
    ce_sum = jnp.sum(partials[:, 0, 0])
    # NOTE: if every target is ignored, torch returns NaN (0/0); we clamp the
    # denominator and return gamma*reg instead (intentional, documented divergence).
    n_valid = jnp.maximum(jnp.sum(partials[:, 0, 1]), 1.0)
    ce = ce_sum / n_valid
    gamma1 = jnp.asarray(gamma, jnp.float32).reshape(-1)
    reg = jnp.asarray(regularization, jnp.float32)
    return ce + gamma1 * reg                                    # shape (1,)


if __name__ == "__main__":
    key = jax.random.PRNGKey(0)
    k_logits, k_tgt, k_reg = jax.random.split(key, 3)

    # Small but multi-tile shapes: N=70 (non-divisible tail), C=32 classes.
    N, C = 70, 32
    out = jax.random.normal(k_logits, (N, C), dtype=jnp.float32).astype(jnp.bfloat16)
    ce_target = jax.random.randint(k_tgt, (N,), 0, C, dtype=jnp.int32)
    regularization = jax.random.uniform(k_reg, (), dtype=jnp.float32)

    # Deterministic parameter init, matching nn.Parameter(torch.tensor([0.01])).
    gamma = jnp.array([0.01], dtype=jnp.float32)

    # Pure-JAX reference (same bf16 inputs, f32 math).
    logits_f32 = out.astype(jnp.float32)
    logp = jax.nn.log_softmax(logits_f32, axis=-1)
    ce_ref = -jnp.mean(logp[jnp.arange(N), ce_target])
    ref = ce_ref + gamma * regularization

    # 1) forced small tile -> exercises the multi-step ragged/masked grid path.
    loss_tiled = jax.block_until_ready(
        costum_loss(out, ce_target, regularization, gamma, block_n=16))
    # 2) auto-sized path -> exercises the VMEM-budget / megacore tile sizing.
    loss_auto = jax.block_until_ready(
        costum_loss(out, ce_target, regularization, gamma))

    for loss in (loss_tiled, loss_auto):
        assert loss.shape == (1,)
        # bf16 exp on v6e/v7x costs ~0.3% relative in the lse -> loose-ish tol.
        assert jnp.allclose(loss, ref, atol=1e-2, rtol=1e-2), (loss, ref)

    print("KERNEL_OK")
</pallas_src>

<mosaic_0001>
module attributes {stable_mosaic.version = 11 : i64} {
  func.func @_ce_partial_kernel(%arg0: i32, %arg1: memref<16x32xbf16, #tpu.memory_space<vmem>>, %arg2: memref<16x1xi32, #tpu.memory_space<vmem>>, %arg3: memref<1x1x2xf32, #tpu.memory_space<smem>>) attributes {dimension_semantics = [#tpu.dimension_semantics<parallel>], iteration_bounds = array<i64: 5>, scalar_prefetch = 0 : i64, scratch_operands = 0 : i64, tpu.core_type = #tpu.core_type<tc>, window_params = [{transform_indices = @transform_0, window_bounds = array<i64: 16, 32>}, {transform_indices = @transform_1, window_bounds = array<i64: 16, 1>}, {transform_indices = @transform_2, window_bounds = array<i64: 1, 1, 2>}]} {
    %c0 = arith.constant 0 : index
    %c0_0 = arith.constant 0 : index
    %0 = vector.load %arg1[%c0, %c0_0] : memref<16x32xbf16, #tpu.memory_space<vmem>>, vector<16x32xbf16>
    %1 = arith.extf %0 : vector<16x32xbf16> to vector<16x32xf32>
    %c0_1 = arith.constant 0 : index
    %c0_2 = arith.constant 0 : index
    %2 = vector.load %arg2[%c0_1, %c0_2] : memref<16x1xi32, #tpu.memory_space<vmem>>, vector<16x1xi32>
    %3 = tpu.iota {dimensions = array<i32: 0>} : vector<16x1xi32>
    %c16_i32 = arith.constant 16 : i32
    %4 = arith.muli %arg0, %c16_i32 : i32
    %5 = vector.broadcast %4 : i32 to vector<16x1xi32>
    %6 = arith.addi %3, %5 : vector<16x1xi32>
    %c70_i32 = arith.constant 70 : i32
    %7 = vector.broadcast %c70_i32 : i32 to vector<16x1xi32>
    %8 = arith.cmpi slt, %6, %7 : vector<16x1xi32>
    %c0_i32 = arith.constant 0 : i32
    %9 = vector.broadcast %c0_i32 : i32 to vector<16x1xi32>
    %10 = arith.cmpi sge, %2, %9 : vector<16x1xi32>
    %11 = arith.andi %8, %10 : vector<16x1xi1>
    %c32_i32 = arith.constant 32 : i32
    %12 = vector.broadcast %c32_i32 : i32 to vector<16x1xi32>
    %13 = arith.cmpi slt, %2, %12 : vector<16x1xi32>
    %14 = arith.andi %11, %13 : vector<16x1xi1>
    %cst = arith.constant dense<0xFF800000> : vector<16xf32>
    %15 = vector.multi_reduction <maximumf>, %1, %cst [1] : vector<16x32xf32> to vector<16xf32>
    %16 = vector.shape_cast %15 : vector<16xf32> to vector<16x1xf32>
    %17 = vector.broadcast %16 : vector<16x1xf32> to vector<16x32xf32>
    %18 = arith.subf %1, %17 : vector<16x32xf32>
    %19 = arith.truncf %18 : vector<16x32xf32> to vector<16x32xbf16>
    %20 = math.exp %19 : vector<16x32xbf16>
    %21 = arith.extf %20 : vector<16x32xbf16> to vector<16x32xf32>
    %cst_3 = arith.constant dense<0.000000e+00> : vector<16xf32>
    %22 = vector.multi_reduction <add>, %21, %cst_3 [1] : vector<16x32xf32> to vector<16xf32>
    %23 = vector.shape_cast %22 : vector<16xf32> to vector<16x1xf32>
    %24 = math.log %23 : vector<16x1xf32>
    %25 = arith.addf %16, %24 : vector<16x1xf32>
    %26 = tpu.iota {dimensions = array<i32: 1>} : vector<16x32xi32>
    %27 = vector.broadcast %2 : vector<16x1xi32> to vector<16x32xi32>
    %28 = arith.cmpi eq, %26, %27 : vector<16x32xi32>
    %cst_4 = arith.constant 0.000000e+00 : f32
    %29 = vector.broadcast %cst_4 : f32 to vector<16x32xf32>
    %30 = arith.select %28, %1, %29 : vector<16x32xi1>, vector<16x32xf32>
    %cst_5 = arith.constant dense<0.000000e+00> : vector<16xf32>
    %31 = vector.multi_reduction <add>, %30, %cst_5 [1] : vector<16x32xf32> to vector<16xf32>
    %32 = vector.shape_cast %31 : vector<16xf32> to vector<16x1xf32>
    %33 = arith.subf %25, %32 : vector<16x1xf32>
    %cst_6 = arith.constant 0.000000e+00 : f32
    %34 = vector.broadcast %cst_6 : f32 to vector<16x1xf32>
    %35 = arith.select %14, %33, %34 : vector<16x1xi1>, vector<16x1xf32>
    %36 = vector.shape_cast %35 : vector<16x1xf32> to vector<1x16x1xf32>
    %cst_7 = arith.constant dense<0.000000e+00> : vector<1xf32>
    %37 = vector.multi_reduction <add>, %36, %cst_7 [1, 2] : vector<1x16x1xf32> to vector<1xf32>
    %38 = vector.shape_cast %37 : vector<1xf32> to vector<1x1x1xf32>
    %39 = vector.extract %38[0, 0, 0] : f32 from vector<1x1x1xf32>
    %c0_8 = arith.constant 0 : index
    %c0_9 = arith.constant 0 : index
    %c0_10 = arith.constant 0 : index
    %40 = memref.load %arg3[%c0_8, %c0_9, %c0_10] : memref<1x1x2xf32, #tpu.memory_space<smem>>
    memref.store %39, %arg3[%c0_8, %c0_9, %c0_10] : memref<1x1x2xf32, #tpu.memory_space<smem>>
    %cst_11 = arith.constant 1.000000e+00 : f32
    %cst_12 = arith.constant 0.000000e+00 : f32
    %41 = vector.broadcast %cst_11 : f32 to vector<16x1xf32>
    %42 = vector.broadcast %cst_12 : f32 to vector<16x1xf32>
    %43 = arith.select %14, %41, %42 : vector<16x1xi1>, vector<16x1xf32>
    %44 = vector.shape_cast %43 : vector<16x1xf32> to vector<1x16x1xf32>
    %cst_13 = arith.constant dense<0.000000e+00> : vector<1xf32>
    %45 = vector.multi_reduction <add>, %44, %cst_13 [1, 2] : vector<1x16x1xf32> to vector<1xf32>
    %46 = vector.shape_cast %45 : vector<1xf32> to vector<1x1x1xf32>
    %47 = vector.extract %46[0, 0, 0] : f32 from vector<1x1x1xf32>
    %c0_14 = arith.constant 0 : index
    %c0_15 = arith.constant 0 : index
    %c1 = arith.constant 1 : index
    %48 = memref.load %arg3[%c0_14, %c0_15, %c1] : memref<1x1x2xf32, #tpu.memory_space<smem>>
    memref.store %47, %arg3[%c0_14, %c0_15, %c1] : memref<1x1x2xf32, #tpu.memory_space<smem>>
    return
  }
  func.func @transform_0(%arg0: i32) -> (i32, i32) {
    %c0_i32 = arith.constant 0 : i32
    %c0_i32_0 = arith.constant 0 : i32
    return %arg0, %c0_i32 : i32, i32
  }
  func.func @transform_1(%arg0: i32) -> (i32, i32) {
    %c0_i32 = arith.constant 0 : i32
    %c0_i32_0 = arith.constant 0 : i32
    return %arg0, %c0_i32 : i32, i32
  }
  func.func @transform_2(%arg0: i32) -> (i32, i32, i32) {
    %c0_i32 = arith.constant 0 : i32
    %c0_i32_0 = arith.constant 0 : i32
    %c0_i32_1 = arith.constant 0 : i32
    return %arg0, %c0_i32, %c0_i32_0 : i32, i32, i32
  }
}

</mosaic_0001>

<bundles_post_ra>
// kernel: tpu_custom_call.1
= control target key start
LH: loop header
LB: loop body
LE: loop exit
PB: predicated region body
PF: predicated region fallthrough
CT: control target
= control target key end

     0   :  { %7 = vsyncpa [#allocation3], 0  ;;  %s638_s0 = inlined_call_operand.vmem [shape: bf16[70,32], index: 0, kind: input, shape index: {}]   ;;  %s639_s1 = inlined_call_operand.vmem [shape: s32[70,1], index: 1, kind: input, shape index: {}]   ;;  %s640_s2 = inlined_call_operand.vmem [shape: f32[5,1,2], index: 2, kind: output, shape index: {}]  }
   0x1   :  { %9 = vsyncpa [#allocation3 + $0x1], 0  ;;  %s525_s9 = smov 0   ;;  %s527_s10 = smov 0  }
   0x2   :  { %s529_s11 = smov 0   ;;  %s531_s12 = smov 0  }
   0x3 LB: > { %s546_s13 = sadd.s32 4294967295, %s506_s12   ;;  %s393_s14 = sadd.s32 4294967294, %s506_s12   ;;  %s506_s12 = sphi %s531_s12, %s650_s12   ;;  %s502_s11 = sphi %s529_s11, %s649_s11   ;;  %s498_s10 = sphi %s527_s10, %s648_s10   ;;  %s494_s9 = sphi %s525_s9, %s647_s9  }
   0x4   : > { %s550_s15 = sadd.s32 1, %s506_s12   ;;  %s74_s16 = sadd.s32 1, %s502_s11 }
   0x5   : > { %s71_s17 = ssub.s32 %s506_s12, %s550_s15  ;;  %p84_p0 = scmp.ne.s32.totalorder %s502_s11, %s498_s10 }
   0x6   : > { %p72_p1 = scmp.eq.s32.totalorder %s71_s17, 0  ;;  %p85_p2 = scmp.eq.s32.totalorder %s546_s13, 4 }
   0x7   : > { %p90_p3 = scmp.ne.s32.totalorder %s498_s10, %s494_s9  ;;  %p91_p4 = scmp.eq.s32.totalorder %s393_s14, 4 }
   0x8   : > { %s561_s18 = scalar_select %p72_p1, %s502_s11, %s74_s16  }
   0x9   : > { %p563_p5 = por %p85_p2, %p84_p0  ;;  %p567_p6 = por %p91_p4, %p90_p3 }
   0xa   : > { %p396_p7 = scmp.ge.s32.totalorder %s506_s12, 1  ;;  %p143_p8 = scmp.lt.s32.totalorder %s506_s12, 6 }
   0xc   : > { %p144_p9 = pnand %p396_p7, %p143_p8 }
   0xd   : > { %s398_s21 = sshll.u32 (!%p144_p9), %s546_s13, 1  ;;  %v508_v0 = vmov (!%p144_p9), 0   ;;  %vm229_vm0 = vcmask (!%p144_p9), 261120   ;;  %v212_v14 = vlaneseq (!%p144_p9)  ;;  %s402_s30 = sshll.u32 (!%p144_p9), %s546_s13, 4  ;;  %vm278_vm13 = vcmask (!%p144_p9), 7168  }
   0xe   : > { %147 = sbr.rel (%p144_p9) target bundleno = 570 (0x23a), region = 28  ;;  %p183_p10 = scmp.lt.s32.totalorder (!%p144_p9), %s398_s21, 8  ;;  %450 = vset.pattern.permute.xlu1 (!%p144_p9), %v508_v0  ;;  %451 = vset.pattern.permute.xlu0 (!%p144_p9), %v508_v0  ;;  %v216_v29 = vstv (!%p144_p9), %s402_s30  ;;  %v509_v34 = vmov (!%p144_p9), 0.0  }
   0xf   : > { %v257_v16 = vand.u32 (!%p144_p9), 127, %v212_v14  ;;  %v213_v27 = vshrl.u32 (!%p144_p9), %v212_v14, 7  ;;  %s175_s3 = sand.u32 (!%p144_p9), 1, %s498_s10   ;;  %s320_s7 = scalar_lea.vmem (!%p144_p9), %s640_s2, %s546_s13 }
  0x10   : > { %s397_s4 = sshll.u32 (!%p144_p9), %s175_s3, 7  ;;  %s322_s14 = sshll.u32 (!%p144_p9), %s320_s7, 4  ;;  %s323_s14 = int_to_ptr.vmem [resolvable:$true] %s322_s14 }
  0x11   : > { %v214_v28 = vadd.s32 (!%p144_p9), 8, %v213_v27  ;;  %v217_v30 = vadd.s32 (!%p144_p9), %v216_v29, %v213_v27  ;;  %s177_s16 = scalar_lea.smem (!%p144_p9), [#allocation2], %s397_s4 }
  0x12   : > { %s307_s17 = scalar_lea.smem (!%p144_p9), %s177_s16, 1 [#allocation2] }
  0x13   : > { %v218_v31 = vadd.s32 (!%p144_p9), %v216_v29, %v214_v28  ;;  %vm219_vm6 = vcmp.lt.s32.totalorder (!%p144_p9), %v217_v30, 70 }
  0x15   : > { %s652_s21 = smov (!%p183_p10, %s398_s21), 8  ;;  %vm220_vm7 = vcmp.lt.s32.totalorder %v218_v31, 70 }
  0x16   : > { %s399_s22 = sshll.u32 %s652_s21, 2  ;;  %s401_s23 = sshll.u32 %s652_s21, 3 }
  0x17   : > { %s186_s26 = scalar_lea.vmem %s638_s0, %s399_s22  ;;  %s200_s29 = scalar_lea.vmem %s639_s1, %s401_s23 }
  0x18   : > { %v407_v1 = vld [vmem:[%s186_s26] sm:$0xff]   ;;  %v211_v5 = vld [vmem:[%s200_s29 + $0x8] sm:$0xff]  ;;  %s310_s22 = scalar_lea.sflag [#allocation3], %s175_s3  ;;  %s458_s23 = scalar_lea.vmem %s323_s14, 16 }
  0x19   : > { %v210_v2 = vld [vmem:[%s200_s29] sm:$0xff]  ;;  %v408_v3 = vunpack.c.l.bf16 %v407_v1  ;;  %v409_v4 = vunpack.c.h.bf16 %v407_v1  ;;  %vm222_vm5 = vcmp.ge.s32.totalorder %v211_v5, 0  ;;  %vm226_vm8 = vcmp.lt.s32.totalorder %v211_v5, 32  ;;  %p459_p11 = scmp.ne.s32.totalorder %s323_s14, %s458_s23  ;;  %s462_s26 = sshll.u32 %s640_s2, 4  ;;  %s463_s26 = int_to_ptr.vmem [resolvable:$false] %s462_s26 }
  0x1a   : > { %259 = vperm.xlu1 %450, %v210_v2   ;;  %vm221_vm3 = vcmp.ge.s32.totalorder %v210_v2, 0  ;;  %vm225_vm4 = vcmp.lt.s32.totalorder %v210_v2, 32  ;;  %vm224_vm11 = vmand %vm220_vm7, %vm222_vm5  ;;  %s464_s13 = scalar_lea.vmem %s463_s26, 80  ;;  %p465_p0 = scmp.lt.s32.totalorder %s323_s14, %s463_s26 }
  0x1b   : > { %v230_v6 = vsel %vm229_vm0, %v408_v3, -inf  ;;  %v233_v7 = vsel %vm229_vm0, %v409_v4, -inf  ;;  %vm223_vm9 = vmand %vm219_vm6, %vm221_vm3  ;;  %p460_p12 = pnand %p459_p11, %p563_p5  ;;  %p466_p1 = scmp.lt.s32.totalorder %s464_s13, %s458_s23 }
  0x1c   : > { %231 = vmax.xlane.f32.xlu0 %v230_v6  ;;  %vm587_vm10 = vmand %vm223_vm9, %vm225_vm4 }
  0x1d   : > { %vm591_vm12 = vmand %vm224_vm11, %vm226_vm8  ;;  %v293_v35 = vsel %vm587_vm10, 1.0, %v509_v34  ;;  %p461_p13 = pneg %p460_p12  ;;  %p467_p2 = por %p466_p1, %p465_p0 }
  0x1e   : > { %262 = vperm.xlu1 %450, %v211_v5   ;;  %v294_v36 = vsel %vm591_vm12, 1.0, %v509_v34  ;;  %v295_v37 = vsel %vm278_vm13, %v293_v35, 0.0 }
  0x1f   : > { %v296_v38 = vsel %vm278_vm13, %v294_v36, 0.0  ;;  %p468_p3 = pnand %p467_p2, %p461_p13 }
  0x20   : > { %234 = vmax.xlane.f32.xlu0 %v233_v7  ;;  %v297_v39 = vadd.f32 %v296_v38, %v295_v37 }
  0x99   : > { %v260_v15 = vpop.permute.xlu1 %259 }
  0x9a   : > { %vm264_vm1 = vcmp.eq.s32.totalorder %v257_v16, %v260_v15 }
  0x9b   : > { %v266_v21 = vsel %vm264_vm1, %v408_v3, 0.0 }
  0x9c   : > { %v268_v24 = vsel %vm229_vm0, %v266_v21, 0.0 }
  0x9d   : > { %v263_v18 = vpop.permute.xlu1 %262 }
  0x9e   : > { %vm265_vm2 = vcmp.eq.s32.totalorder %v257_v16, %v263_v18 }
  0x9f   : > { %v267_v25 = vsel %vm265_vm2, %v409_v4, 0.0 }
  0xa0   : > { %v271_v26 = vsel %vm229_vm0, %v267_v25, 0.0 }
  0xa9   : > { %v232_v8 = vpop.xlane.xlu0 %231 }
  0xaa   : > { %v236_v10 = vsub.f32 %v408_v3, %v232_v8 }
  0xad   : > { %v235_v9 = vpop.xlane.xlu0 %234 }
  0xae   : > { %v237_v11 = vsub.f32 %v409_v4, %v235_v9 }
  0xb0   : > { %v238_v12 = vpack.c.bf16 %v237_v11, %v236_v10 }
  0xb2   : > { %v240_v13 = vmul.bf16 1069105081, %v238_v12 }
  0xb4   : > { %452 = vpow.bf16 %v240_v13 }
  0xbf   : > { %v453_v17 = vpop.eup %452 }
  0xc0   : > { %v243_v19 = vunpack.c.h.bf16 %v453_v17  ;;  %v242_v20 = vunpack.c.l.bf16 %v453_v17 }
  0xc2   : > { %v247_v22 = vsel %vm229_vm0, %v243_v19, 0.0  ;;  %v244_v23 = vsel %vm229_vm0, %v242_v20, 0.0 }
  0xc3   : > { %248 = vadd.xlane.f32.xlu1 %v247_v22  ;;  %245 = vadd.xlane.f32.xlu0 %v244_v23 }
  0xc7   : > { %269 = vadd.xlane.f32.xlu0 %v268_v24 }
  0xcb   : > { %272 = vadd.xlane.f32.xlu0 %v271_v26 }
 0x150   : > { %v249_v40 = vpop.xlane.xlu1 %248  ;;  %v246_v41 = vpop.xlane.xlu0 %245 }
 0x151   : > { %454 = vlog2.f32 %v249_v40 }
 0x152   : > { %456 = vlog2.f32 %v246_v41 }
 0x154   : > { %v270_v42 = vpop.xlane.xlu0 %269 }
 0x158   : > { %v273_v49 = vpop.xlane.xlu0 %272 }
 0x15b   : > { %v455_v43 = vpop.eup %454 }
 0x15c   : > { %v457_v44 = vpop.eup %456  ;;  %v253_v45 = vmul.f32 0.6931472, %v455_v43 }
 0x15d   : > { %v251_v46 = vmul.f32 0.6931472, %v457_v44 }
 0x15e   : > { %v255_v47 = vadd.f32 %v253_v45, %v235_v9 }
 0x15f   : > { %v254_v48 = vadd.f32 %v251_v46, %v232_v8 }
 0x160   : > { %v275_v50 = vsub.f32 %v255_v47, %v273_v49 }
 0x161   : > { %v274_v51 = vsub.f32 %v254_v48, %v270_v42 }
 0x162   : > { %v277_v52 = vsel %vm591_vm12, %v275_v50, 0.0 }
 0x163   : > { %v276_v53 = vsel %vm587_vm10, %v274_v51, 0.0  ;;  %v280_v54 = vsel %vm278_vm13, %v277_v52, 0.0 }
 0x164   : > { %v279_v55 = vsel %vm278_vm13, %v276_v53, 0.0 }
 0x165   : > { %v281_v56 = vadd.f32 %v280_v54, %v279_v55 }
 0x167   : > { %282 = vadd.xlane.f32.xlu0 %v281_v56 }
 0x16b   : > { %298 = vadd.xlane.f32.xlu0 %v297_v39 }
 0x1f4   : > { %v283_v57 = vpop.xlane.xlu0 %282 }
 0x1f5   : > { %v284_v58 = vrot.slane %v283_v57, 4 }
 0x1f7   : > { %v285_v59 = vadd.f32 %v284_v58, %v283_v57 }
 0x1f8   : > { %v299_v60 = vpop.xlane.xlu0 %298 }
 0x1f9   : > { %v286_v61 = vrot.slane %v285_v59, 2  ;;  %v300_v62 = vrot.slane %v299_v60, 4 }
 0x1fb   : > { %v301_v63 = vadd.f32 %v300_v62, %v299_v60  ;;  %v287_v0 = vadd.f32 %v286_v61, %v285_v59 }
 0x1fd   : > { %v302_v1 = vrot.slane %v301_v63, 2  ;;  %v288_v2 = vrot.slane %v287_v0, 1 }
 0x1ff   : > { %v303_v3 = vadd.f32 %v302_v1, %v301_v63  ;;  %v289_v4 = vadd.f32 %v288_v2, %v287_v0 }
 0x201   : > { %410 = vpush %v289_v4  ;;  %v304_v5 = vrot.slane %v303_v3, 1 }
 0x203   : > { %v305_v6 = vadd.f32 %v304_v5, %v303_v3 }
 0x205   : > { %412 = vpush %v305_v6 }
 0x232   : > { %s411_s8 = spop %410 }
 0x233   : > { %292 = sst [smem:[%s177_s16]] %s411_s8 }
 0x236   : > { %s413_s21 = spop %412 }
 0x237   : > { %308 = sst [smem:[%s307_s17]] %s413_s21 }
 0x238   : > { %471 = shalt.err (!%p468_p3)
}
 0x239   : > { %414 = dma.smem_to_vmem (%p563_p5), %s177_s16, 16, %s323_s14, %s310_s22  }
 0x23a PF: > { %p405_p4 = scmp.lt.s32.totalorder %s506_s12, 2 }
 0x23b   : > { %s334_s27 = sand.u32 (!%p405_p4), 1, %s494_s9  }
 0x23c   : > { %329 = sbr.rel (%p405_p4) target bundleno = 582 (0x246), region = 36  ;;  %s335_s28 = scalar_lea.sflag (!%p405_p4), [#allocation3], %s334_s27 }
 0x243   : > { %489 = dma.done.wait (%p567_p6), %s335_s28, 16  }
 0x244   : > { %491 = vsyncadd (%p567_p6), %s335_s28, 4294967280 }
 0x245   : > { %340 = sfence }
 0x246 PF: > { %p12_p5 = scmp.ge.s32.totalorder %s550_s15, 7   ;;  %s647_s9 = smov %s498_s10 }
 0x247   : > { %s648_s10 = smov %s502_s11  ;;  %s649_s11 = smov %s561_s18 }
 0x248   : > { %s650_s12 = smov %s550_s15  ;;  %14 = sbr.rel (!%p12_p5) target bundleno = 3 (0x3), region = 68 }
 0x24f   :  { %341 = vsyncpa [#allocation3], 1 }
 0x250   :  { %343 = vsyncpa [#allocation3 + $0x1], 1 }

</bundles_post_ra>
